<compile_context>
chip_gen: v5e
topology: v5e:2x2
jax: 0.10.0
libtpu: 0.0.40
codegen_flags: <defaults>
</compile_context>

<pallas_src>
import jax
import jax.numpy as jnp
from jax.experimental import pallas as pl
from jax.experimental.pallas import tpu as pltpu


# ----------------------------------------------------------------------------
# Kernel
# ----------------------------------------------------------------------------
def sal_pointnet_kernel(p_ref, w_pos_ref, w_blk_ref, w_ms_ref, b_ref, out_ref):
    f32 = jnp.float32
    relu = lambda x: jnp.maximum(x, 0.0)

    TB, N, Dp = p_ref.shape          # batch tile, points per cloud, padded in_dim
    _, h2, h = w_blk_ref.shape       # (4, 2*hidden, hidden)
    c2 = w_ms_ref.shape[1]           # 2 * c_dim (mean || std)

    biases = b_ref[...]              # (8, W) zero-padded bias slab (single load)
    b_pos = biases[0:1, :h2]         # (1, 2h)
    b_ms = biases[5:6, :c2]          # (1, 2*c_dim)

    # Flatten the batch tile so every Linear is one big MXU matmul.
    p = p_ref[...].reshape(TB * N, Dp)

    # fc_pos
    net = jnp.dot(p, w_pos_ref[...], preferred_element_type=f32) + b_pos         # (TB*N, 2h)
    # fc_0(relu(net))
    net = (jnp.dot(relu(net), w_blk_ref[0], preferred_element_type=f32)
           + biases[1:2, :h])                                                     # (TB*N, h)

    # fc_1..fc_3 :  fc(relu(cat([net, pooled])))  ==  relu(net) @ W[:h] + relu(pooled) @ W[h:]
    for k in (1, 2, 3):
        w = w_blk_ref[k]                                                          # (2h, h)
        pooled = jnp.max(net.reshape(TB, N, h), axis=1)                           # (TB, h) per-cloud max
        pooled_term = jnp.dot(relu(pooled), w[h:], preferred_element_type=f32)    # (TB, h)
        body = (jnp.dot(relu(net), w[:h], preferred_element_type=f32)
                + biases[k + 1:k + 2, :h])                                        # (TB*N, h)
        net = (body.reshape(TB, N, h) + pooled_term[:, None, :]).reshape(TB * N, h)

    # final pool over points, then fused fc_mean||fc_std head
    feat = relu(jnp.max(net.reshape(TB, N, h), axis=1))                           # (TB, h)
    out_ref[0] = jnp.dot(feat, w_ms_ref[...], preferred_element_type=f32) + b_ms  # (TB, 2*c_dim)


# ----------------------------------------------------------------------------
# Wrapper
# ----------------------------------------------------------------------------
def _choose_tb(B, N, h2, vmem_activation_budget=6 << 20):
    """Pick the batch tile: fill MXU rows, respect VMEM, keep >=2 grid steps."""
    tb = 1
    # grow until the MXU M dimension (tb*N rows) is reasonably filled
    while tb < B and tb * N < 128 and tb < 64:
        tb *= 2
    # keep live f32 activations (a few (tb*N, 2h) buffers) well inside VMEM
    while tb > 1 and tb * N * h2 * 4 * 8 > vmem_activation_budget:
        tb //= 2
    # keep >= 2 parallel grid steps so both v7x TensorCores get work
    while tb > 1 and -(-B // tb) < 2:
        tb //= 2
    return tb


def sal_pointnet_forward(p, packed, *, tb=None):
    """p: (B, N, in_dim) float32.  Returns (c_mean, c_std): (B, c_dim) each."""
    B, N, in_dim = p.shape
    Dp, h2 = packed["w_pos"].shape
    h = h2 // 2
    c2 = packed["w_ms"].shape[1]
    c_dim = c2 // 2
    W = packed["b"].shape[1]
    assert in_dim == packed["in_dim"]

    if tb is None:
        tb = _choose_tb(B, N, h2)
    grid = -(-B // tb)
    b_pad = grid * tb

    # Pad batch to a multiple of TB and feature dim to the lane-friendly Dp.
    # (Padded batch rows never mix with real ones — pooling is per-cloud — and
    #  their outputs are sliced off below.)
    p_pad = jnp.zeros((b_pad, N, Dp), jnp.float32)
    p_pad = p_pad.at[:B, :, :in_dim].set(p.astype(jnp.float32))

    out = pl.pallas_call(
        sal_pointnet_kernel,
        out_shape=jax.ShapeDtypeStruct((grid, tb, c2), jnp.float32),
        grid_spec=pltpu.PrefetchScalarGridSpec(
            num_scalar_prefetch=0,
            grid=(grid,),
            in_specs=[
                pl.BlockSpec((tb, N, Dp), lambda b: (b, 0, 0)),      # points tile
                pl.BlockSpec((Dp, h2), lambda b: (0, 0)),            # fc_pos weight (padded rows)
                pl.BlockSpec((4, h2, h), lambda b: (0, 0, 0)),       # fc_0..fc_3 stacked
                pl.BlockSpec((h, c2), lambda b: (0, 0)),             # fused fc_mean||fc_std
                pl.BlockSpec((8, W), lambda b: (0, 0)),              # bias slab
            ],
            out_specs=pl.BlockSpec((1, tb, c2), lambda b: (b, 0, 0)),
        ),
        compiler_params=pltpu.CompilerParams(
            dimension_semantics=("parallel",),
            vmem_limit_bytes=32 * 1024 * 1024,
        ),
    )(p_pad, packed["w_pos"], packed["w_blk"], packed["w_ms"], packed["b"])

    out = out.reshape(b_pad, c2)[:B]
    return out[:, :c_dim], out[:, c_dim:]


# ----------------------------------------------------------------------------
# Parameters
# ----------------------------------------------------------------------------
def init_params(key, in_dim=3, hidden_dim=32, c_dim=64, nontrivial_head=False):
    """Synthetic init mirroring the PyTorch module.  With nontrivial_head=False
    fc_mean/fc_std follow the module's constant init (weight=0, bias=0 / -10),
    which makes the outputs constant; set True for a meaningful numeric check."""
    h, h2 = hidden_dim, 2 * hidden_dim
    ks = jax.random.split(key, 9)

    def lin(k, fan_in, fan_out):
        kw, kb = jax.random.split(k)
        bound = 1.0 / jnp.sqrt(fan_in)
        w = jax.random.uniform(kw, (fan_in, fan_out), jnp.float32, -bound, bound)
        b = jax.random.uniform(kb, (fan_out,), jnp.float32, -bound, bound)
        return w, b

    w_pos, b_pos = lin(ks[0], in_dim, h2)
    w0, b0 = lin(ks[1], h2, h)
    w1, b1 = lin(ks[2], h2, h)
    w2, b2 = lin(ks[3], h2, h)
    w3, b3 = lin(ks[4], h2, h)

    if nontrivial_head:
        wm = 0.1 * jax.random.normal(ks[5], (h, c_dim), jnp.float32)
        ws = 0.1 * jax.random.normal(ks[6], (h, c_dim), jnp.float32)
        bm = 0.1 * jax.random.normal(ks[7], (c_dim,), jnp.float32)
        bs = -10.0 + 0.1 * jax.random.normal(ks[8], (c_dim,), jnp.float32)
    else:
        wm = jnp.zeros((h, c_dim), jnp.float32)
        bm = jnp.zeros((c_dim,), jnp.float32)
        ws = jnp.zeros((h, c_dim), jnp.float32)
        bs = jnp.full((c_dim,), -10.0, jnp.float32)

    return dict(w_pos=w_pos, b_pos=b_pos, w0=w0, b0=b0, w1=w1, b1=b1,
                w2=w2, b2=b2, w3=w3, b3=b3, wm=wm, bm=bm, ws=ws, bs=bs)


def pack_params(params):
    """Pack the 17 torch-style tensors into 4 kernel inputs."""
    f32 = jnp.float32
    in_dim, h2 = params["w_pos"].shape
    h = h2 // 2
    c_dim = params["wm"].shape[1]
    c2 = 2 * c_dim
    Dp = max(8, ((in_dim + 7) // 8) * 8)   # pad K of the first matmul (3 -> 8)
    W = max(h2, c2)

    w_pos = jnp.zeros((Dp, h2), f32).at[:in_dim].set(params["w_pos"].astype(f32))
    w_blk = jnp.stack([params["w0"], params["w1"],
                       params["w2"], params["w3"]]).astype(f32)          # (4, 2h, h)
    w_ms = jnp.concatenate([params["wm"], params["ws"]], axis=1).astype(f32)  # (h, 2c)

    b = jnp.zeros((8, W), f32)
    b = b.at[0, :h2].set(params["b_pos"].astype(f32))
    b = b.at[1, :h].set(params["b0"].astype(f32))
    b = b.at[2, :h].set(params["b1"].astype(f32))
    b = b.at[3, :h].set(params["b2"].astype(f32))
    b = b.at[4, :h].set(params["b3"].astype(f32))
    b = b.at[5, :c2].set(jnp.concatenate([params["bm"], params["bs"]]).astype(f32))

    return dict(w_pos=w_pos, w_blk=w_blk, w_ms=w_ms, b=b,
                in_dim=in_dim, h=h, c_dim=c_dim)


# ----------------------------------------------------------------------------
# Plain-JAX reference (mirrors the PyTorch graph, with the concat)
# ----------------------------------------------------------------------------
def reference_forward(p, params):
    relu = lambda x: jnp.maximum(x, 0.0)
    hp = jax.lax.Precision.HIGHEST
    dot = lambda a, b: jnp.dot(a, b, precision=hp)

    net = dot(p, params["w_pos"]) + params["b_pos"]
    net = dot(relu(net), params["w0"]) + params["b0"]
    for k in (1, 2, 3):
        pooled = jnp.max(net, axis=1, keepdims=True)
        pooled = jnp.broadcast_to(pooled, net.shape)
        net = dot(relu(jnp.concatenate([net, pooled], axis=2)),
                  params[f"w{k}"]) + params[f"b{k}"]
    net = jnp.max(net, axis=1)
    feat = relu(net)
    c_mean = dot(feat, params["wm"]) + params["bm"]
    c_std = dot(feat, params["ws"]) + params["bs"]
    return c_mean, c_std


# ----------------------------------------------------------------------------
# Test
# ----------------------------------------------------------------------------
if __name__ == "__main__":
    base_key = jax.random.PRNGKey(0)

    configs = [
        dict(B=8, N=16, in_dim=3, hidden_dim=32, c_dim=64),   # TB=4 -> grid=2
        dict(B=3, N=8, in_dim=3, hidden_dim=32, c_dim=64),    # exercises batch padding
    ]

    for i, cfg in enumerate(configs):
        kp, kd = jax.random.split(jax.random.fold_in(base_key, i))
        # nontrivial_head=True replaces the module's zero-initialized head with
        # small random values so the numeric check is not trivially 0 / -10.
        params = init_params(kp, in_dim=cfg["in_dim"], hidden_dim=cfg["hidden_dim"],
                             c_dim=cfg["c_dim"], nontrivial_head=True)
        packed = pack_params(params)
        p = jax.random.normal(kd, (cfg["B"], cfg["N"], cfg["in_dim"]), jnp.float32)

        c_mean, c_std = sal_pointnet_forward(p, packed)
        jax.block_until_ready((c_mean, c_std))

        ref_mean, ref_std = reference_forward(p, params)
        assert c_mean.shape == (cfg["B"], cfg["c_dim"])
        assert c_std.shape == (cfg["B"], cfg["c_dim"])
        assert jnp.allclose(c_mean, ref_mean, atol=1e-4, rtol=1e-4), f"mean mismatch cfg {i}"
        assert jnp.allclose(c_std, ref_std, atol=1e-4, rtol=1e-4), f"std mismatch cfg {i}"

    print("KERNEL_OK")
</pallas_src>

<mosaic_0001>
module attributes {stable_mosaic.version = 11 : i64} {
  func.func @sal_pointnet_kernel(%arg0: i32, %arg1: memref<4x16x8xf32, #tpu.memory_space<vmem>>, %arg2: memref<8x64xf32, #tpu.memory_space<vmem>>, %arg3: memref<4x64x32xf32, #tpu.memory_space<vmem>>, %arg4: memref<32x128xf32, #tpu.memory_space<vmem>>, %arg5: memref<8x128xf32, #tpu.memory_space<vmem>>, %arg6: memref<1x4x128xf32, #tpu.memory_space<vmem>>) attributes {dimension_semantics = [#tpu.dimension_semantics<parallel>], iteration_bounds = array<i64: 2>, scalar_prefetch = 0 : i64, scratch_operands = 0 : i64, tpu.core_type = #tpu.core_type<tc>, window_params = [{transform_indices = @transform_0, window_bounds = array<i64: 4, 16, 8>}, {pipeline_mode = #tpu.pipeline_mode<synchronous>, transform_indices = @transform_1, window_bounds = array<i64: 8, 64>}, {pipeline_mode = #tpu.pipeline_mode<synchronous>, transform_indices = @transform_2, window_bounds = array<i64: 4, 64, 32>}, {pipeline_mode = #tpu.pipeline_mode<synchronous>, transform_indices = @transform_3, window_bounds = array<i64: 32, 128>}, {pipeline_mode = #tpu.pipeline_mode<synchronous>, transform_indices = @transform_4, window_bounds = array<i64: 8, 128>}, {transform_indices = @transform_5, window_bounds = array<i64: 1, 4, 128>}]} {
    %c0 = arith.constant 0 : index
    %c0_0 = arith.constant 0 : index
    %0 = vector.load %arg5[%c0, %c0_0] : memref<8x128xf32, #tpu.memory_space<vmem>>, vector<8x128xf32>
    %1 = vector.extract_strided_slice %0 {offsets = [0, 0], sizes = [1, 64], strides = [1, 1]} : vector<8x128xf32> to vector<1x64xf32>
    %2 = vector.extract_strided_slice %0 {offsets = [5, 0], sizes = [1, 128], strides = [1, 1]} : vector<8x128xf32> to vector<1x128xf32>
    %c0_1 = arith.constant 0 : index
    %c0_2 = arith.constant 0 : index
    %c0_3 = arith.constant 0 : index
    %3 = vector.load %arg1[%c0_1, %c0_2, %c0_3] : memref<4x16x8xf32, #tpu.memory_space<vmem>>, vector<4x16x8xf32>
    %4 = vector.shape_cast %3 : vector<4x16x8xf32> to vector<64x8xf32>
    %c0_4 = arith.constant 0 : index
    %c0_5 = arith.constant 0 : index
    %5 = vector.load %arg2[%c0_4, %c0_5] : memref<8x64xf32, #tpu.memory_space<vmem>>, vector<8x64xf32>
    %cst = arith.constant dense<0.000000e+00> : vector<64x64xf32>
    %6 = tpu.matmul %4, %5, %cst {dimension_numbers = #tpu.dot_dimension_numbers<[1], [0], [0], [1], [0, 0, 1, 1], [], []>} : vector<64x8xf32>, vector<8x64xf32>, vector<64x64xf32> -> vector<64x64xf32>
    %7 = vector.broadcast %1 : vector<1x64xf32> to vector<64x64xf32>
    %8 = arith.addf %6, %7 : vector<64x64xf32>
    %cst_6 = arith.constant 0.000000e+00 : f32
    %9 = vector.broadcast %cst_6 : f32 to vector<64x64xf32>
    %10 = arith.maximumf %8, %9 : vector<64x64xf32>
    %c0_7 = arith.constant 0 : index
    %c0_8 = arith.constant 0 : index
    %c0_9 = arith.constant 0 : index
    %11 = vector.load %arg3[%c0_7, %c0_8, %c0_9] : memref<4x64x32xf32, #tpu.memory_space<vmem>>, vector<1x64x32xf32>
    %12 = vector.shape_cast %11 : vector<1x64x32xf32> to vector<64x32xf32>
    %cst_10 = arith.constant dense<0.000000e+00> : vector<64x32xf32>
    %13 = tpu.matmul %10, %12, %cst_10 {dimension_numbers = #tpu.dot_dimension_numbers<[1], [0], [0], [1], [0, 0, 1, 1], [], []>} : vector<64x64xf32>, vector<64x32xf32>, vector<64x32xf32> -> vector<64x32xf32>
    %14 = vector.extract_strided_slice %0 {offsets = [1, 0], sizes = [1, 32], strides = [1, 1]} : vector<8x128xf32> to vector<1x32xf32>
    %15 = vector.broadcast %14 : vector<1x32xf32> to vector<64x32xf32>
    %16 = arith.addf %13, %15 : vector<64x32xf32>
    %c1 = arith.constant 1 : index
    %c0_11 = arith.constant 0 : index
    %c0_12 = arith.constant 0 : index
    %17 = vector.load %arg3[%c1, %c0_11, %c0_12] : memref<4x64x32xf32, #tpu.memory_space<vmem>>, vector<1x64x32xf32>
    %18 = vector.shape_cast %17 : vector<1x64x32xf32> to vector<64x32xf32>
    %19 = vector.shape_cast %16 : vector<64x32xf32> to vector<4x16x32xf32>
    %cst_13 = arith.constant dense<0xFF800000> : vector<4x32xf32>
    %20 = vector.multi_reduction <maximumf>, %19, %cst_13 [1] : vector<4x16x32xf32> to vector<4x32xf32>
    %cst_14 = arith.constant 0.000000e+00 : f32
    %21 = vector.broadcast %cst_14 : f32 to vector<4x32xf32>
    %22 = arith.maximumf %20, %21 : vector<4x32xf32>
    %23 = vector.extract_strided_slice %18 {offsets = [32, 0], sizes = [32, 32], strides = [1, 1]} : vector<64x32xf32> to vector<32x32xf32>
    %cst_15 = arith.constant dense<0.000000e+00> : vector<4x32xf32>
    %24 = tpu.matmul %22, %23, %cst_15 {dimension_numbers = #tpu.dot_dimension_numbers<[1], [0], [0], [1], [0, 0, 1, 1], [], []>} : vector<4x32xf32>, vector<32x32xf32>, vector<4x32xf32> -> vector<4x32xf32>
    %cst_16 = arith.constant 0.000000e+00 : f32
    %25 = vector.broadcast %cst_16 : f32 to vector<64x32xf32>
    %26 = arith.maximumf %16, %25 : vector<64x32xf32>
    %27 = vector.extract_strided_slice %18 {offsets = [0, 0], sizes = [32, 32], strides = [1, 1]} : vector<64x32xf32> to vector<32x32xf32>
    %cst_17 = arith.constant dense<0.000000e+00> : vector<64x32xf32>
    %28 = tpu.matmul %26, %27, %cst_17 {dimension_numbers = #tpu.dot_dimension_numbers<[1], [0], [0], [1], [0, 0, 1, 1], [], []>} : vector<64x32xf32>, vector<32x32xf32>, vector<64x32xf32> -> vector<64x32xf32>
    %29 = vector.extract_strided_slice %0 {offsets = [2, 0], sizes = [1, 32], strides = [1, 1]} : vector<8x128xf32> to vector<1x32xf32>
    %30 = vector.broadcast %29 : vector<1x32xf32> to vector<64x32xf32>
    %31 = arith.addf %28, %30 : vector<64x32xf32>
    %32 = vector.shape_cast %31 : vector<64x32xf32> to vector<4x16x32xf32>
    %33 = vector.shape_cast %24 : vector<4x32xf32> to vector<4x1x32xf32>
    %34 = vector.broadcast %33 : vector<4x1x32xf32> to vector<4x16x32xf32>
    %35 = arith.addf %32, %34 : vector<4x16x32xf32>
    %36 = vector.shape_cast %35 : vector<4x16x32xf32> to vector<64x32xf32>
    %c2 = arith.constant 2 : index
    %c0_18 = arith.constant 0 : index
    %c0_19 = arith.constant 0 : index
    %37 = vector.load %arg3[%c2, %c0_18, %c0_19] : memref<4x64x32xf32, #tpu.memory_space<vmem>>, vector<1x64x32xf32>
    %38 = vector.shape_cast %37 : vector<1x64x32xf32> to vector<64x32xf32>
    %39 = vector.shape_cast %36 : vector<64x32xf32> to vector<4x16x32xf32>
    %cst_20 = arith.constant dense<0xFF800000> : vector<4x32xf32>
    %40 = vector.multi_reduction <maximumf>, %39, %cst_20 [1] : vector<4x16x32xf32> to vector<4x32xf32>
    %cst_21 = arith.constant 0.000000e+00 : f32
    %41 = vector.broadcast %cst_21 : f32 to vector<4x32xf32>
    %42 = arith.maximumf %40, %41 : vector<4x32xf32>
    %43 = vector.extract_strided_slice %38 {offsets = [32, 0], sizes = [32, 32], strides = [1, 1]} : vector<64x32xf32> to vector<32x32xf32>
    %cst_22 = arith.constant dense<0.000000e+00> : vector<4x32xf32>
    %44 = tpu.matmul %42, %43, %cst_22 {dimension_numbers = #tpu.dot_dimension_numbers<[1], [0], [0], [1], [0, 0, 1, 1], [], []>} : vector<4x32xf32>, vector<32x32xf32>, vector<4x32xf32> -> vector<4x32xf32>
    %cst_23 = arith.constant 0.000000e+00 : f32
    %45 = vector.broadcast %cst_23 : f32 to vector<64x32xf32>
    %46 = arith.maximumf %36, %45 : vector<64x32xf32>
    %47 = vector.extract_strided_slice %38 {offsets = [0, 0], sizes = [32, 32], strides = [1, 1]} : vector<64x32xf32> to vector<32x32xf32>
    %cst_24 = arith.constant dense<0.000000e+00> : vector<64x32xf32>
    %48 = tpu.matmul %46, %47, %cst_24 {dimension_numbers = #tpu.dot_dimension_numbers<[1], [0], [0], [1], [0, 0, 1, 1], [], []>} : vector<64x32xf32>, vector<32x32xf32>, vector<64x32xf32> -> vector<64x32xf32>
    %49 = vector.extract_strided_slice %0 {offsets = [3, 0], sizes = [1, 32], strides = [1, 1]} : vector<8x128xf32> to vector<1x32xf32>
    %50 = vector.broadcast %49 : vector<1x32xf32> to vector<64x32xf32>
    %51 = arith.addf %48, %50 : vector<64x32xf32>
    %52 = vector.shape_cast %51 : vector<64x32xf32> to vector<4x16x32xf32>
    %53 = vector.shape_cast %44 : vector<4x32xf32> to vector<4x1x32xf32>
    %54 = vector.broadcast %53 : vector<4x1x32xf32> to vector<4x16x32xf32>
    %55 = arith.addf %52, %54 : vector<4x16x32xf32>
    %56 = vector.shape_cast %55 : vector<4x16x32xf32> to vector<64x32xf32>
    %c3 = arith.constant 3 : index
    %c0_25 = arith.constant 0 : index
    %c0_26 = arith.constant 0 : index
    %57 = vector.load %arg3[%c3, %c0_25, %c0_26] : memref<4x64x32xf32, #tpu.memory_space<vmem>>, vector<1x64x32xf32>
    %58 = vector.shape_cast %57 : vector<1x64x32xf32> to vector<64x32xf32>
    %59 = vector.shape_cast %56 : vector<64x32xf32> to vector<4x16x32xf32>
    %cst_27 = arith.constant dense<0xFF800000> : vector<4x32xf32>
    %60 = vector.multi_reduction <maximumf>, %59, %cst_27 [1] : vector<4x16x32xf32> to vector<4x32xf32>
    %cst_28 = arith.constant 0.000000e+00 : f32
    %61 = vector.broadcast %cst_28 : f32 to vector<4x32xf32>
    %62 = arith.maximumf %60, %61 : vector<4x32xf32>
    %63 = vector.extract_strided_slice %58 {offsets = [32, 0], sizes = [32, 32], strides = [1, 1]} : vector<64x32xf32> to vector<32x32xf32>
    %cst_29 = arith.constant dense<0.000000e+00> : vector<4x32xf32>
    %64 = tpu.matmul %62, %63, %cst_29 {dimension_numbers = #tpu.dot_dimension_numbers<[1], [0], [0], [1], [0, 0, 1, 1], [], []>} : vector<4x32xf32>, vector<32x32xf32>, vector<4x32xf32> -> vector<4x32xf32>
    %cst_30 = arith.constant 0.000000e+00 : f32
    %65 = vector.broadcast %cst_30 : f32 to vector<64x32xf32>
    %66 = arith.maximumf %56, %65 : vector<64x32xf32>
    %67 = vector.extract_strided_slice %58 {offsets = [0, 0], sizes = [32, 32], strides = [1, 1]} : vector<64x32xf32> to vector<32x32xf32>
    %cst_31 = arith.constant dense<0.000000e+00> : vector<64x32xf32>
    %68 = tpu.matmul %66, %67, %cst_31 {dimension_numbers = #tpu.dot_dimension_numbers<[1], [0], [0], [1], [0, 0, 1, 1], [], []>} : vector<64x32xf32>, vector<32x32xf32>, vector<64x32xf32> -> vector<64x32xf32>
    %69 = vector.extract_strided_slice %0 {offsets = [4, 0], sizes = [1, 32], strides = [1, 1]} : vector<8x128xf32> to vector<1x32xf32>
    %70 = vector.broadcast %69 : vector<1x32xf32> to vector<64x32xf32>
    %71 = arith.addf %68, %70 : vector<64x32xf32>
    %72 = vector.shape_cast %71 : vector<64x32xf32> to vector<4x16x32xf32>
    %73 = vector.shape_cast %64 : vector<4x32xf32> to vector<4x1x32xf32>
    %74 = vector.broadcast %73 : vector<4x1x32xf32> to vector<4x16x32xf32>
    %75 = arith.addf %72, %74 : vector<4x16x32xf32>
    %76 = vector.shape_cast %75 : vector<4x16x32xf32> to vector<64x32xf32>
    %77 = vector.shape_cast %76 : vector<64x32xf32> to vector<4x16x32xf32>
    %cst_32 = arith.constant dense<0xFF800000> : vector<4x32xf32>
    %78 = vector.multi_reduction <maximumf>, %77, %cst_32 [1] : vector<4x16x32xf32> to vector<4x32xf32>
    %cst_33 = arith.constant 0.000000e+00 : f32
    %79 = vector.broadcast %cst_33 : f32 to vector<4x32xf32>
    %80 = arith.maximumf %78, %79 : vector<4x32xf32>
    %c0_34 = arith.constant 0 : index
    %c0_35 = arith.constant 0 : index
    %81 = vector.load %arg4[%c0_34, %c0_35] : memref<32x128xf32, #tpu.memory_space<vmem>>, vector<32x128xf32>
    %cst_36 = arith.constant dense<0.000000e+00> : vector<4x128xf32>
    %82 = tpu.matmul %80, %81, %cst_36 {dimension_numbers = #tpu.dot_dimension_numbers<[1], [0], [0], [1], [0, 0, 1, 1], [], []>} : vector<4x32xf32>, vector<32x128xf32>, vector<4x128xf32> -> vector<4x128xf32>
    %83 = vector.broadcast %2 : vector<1x128xf32> to vector<4x128xf32>
    %84 = arith.addf %82, %83 : vector<4x128xf32>
    %c0_37 = arith.constant 0 : index
    %c0_38 = arith.constant 0 : index
    %c0_39 = arith.constant 0 : index
    %85 = vector.load %arg6[%c0_37, %c0_38, %c0_39] : memref<1x4x128xf32, #tpu.memory_space<vmem>>, vector<1x4x128xf32>
    %86 = vector.shape_cast %85 : vector<1x4x128xf32> to vector<4x128xf32>
    %87 = vector.shape_cast %84 : vector<4x128xf32> to vector<1x4x128xf32>
    tpu.vector_store %arg6[%c0_37, %c0_38, %c0_39], %87 {strides = array<i32>} : memref<1x4x128xf32, #tpu.memory_space<vmem>>, vector<1x4x128xf32>,
    return
  }
  func.func @transform_0(%arg0: i32) -> (i32, i32, i32) {
    %c0_i32 = arith.constant 0 : i32
    %c0_i32_0 = arith.constant 0 : i32
    %c0_i32_1 = arith.constant 0 : i32
    return %arg0, %c0_i32, %c0_i32_0 : i32, i32, i32
  }
  func.func @transform_1(%arg0: i32) -> (i32, i32) {
    %c0_i32 = arith.constant 0 : i32
    %c0_i32_0 = arith.constant 0 : i32
    %c0_i32_1 = arith.constant 0 : i32
    return %c0_i32, %c0_i32_0 : i32, i32
  }
  func.func @transform_2(%arg0: i32) -> (i32, i32, i32) {
    %c0_i32 = arith.constant 0 : i32
    %c0_i32_0 = arith.constant 0 : i32
    %c0_i32_1 = arith.constant 0 : i32
    %c0_i32_2 = arith.constant 0 : i32
    return %c0_i32, %c0_i32_0, %c0_i32_1 : i32, i32, i32
  }
  func.func @transform_3(%arg0: i32) -> (i32, i32) {
    %c0_i32 = arith.constant 0 : i32
    %c0_i32_0 = arith.constant 0 : i32
    %c0_i32_1 = arith.constant 0 : i32
    return %c0_i32, %c0_i32_0 : i32, i32
  }
  func.func @transform_4(%arg0: i32) -> (i32, i32) {
    %c0_i32 = arith.constant 0 : i32
    %c0_i32_0 = arith.constant 0 : i32
    %c0_i32_1 = arith.constant 0 : i32
    return %c0_i32, %c0_i32_0 : i32, i32
  }
  func.func @transform_5(%arg0: i32) -> (i32, i32, i32) {
    %c0_i32 = arith.constant 0 : i32
    %c0_i32_0 = arith.constant 0 : i32
    %c0_i32_1 = arith.constant 0 : i32
    return %arg0, %c0_i32, %c0_i32_0 : i32, i32, i32
  }
}

</mosaic_0001>

<bundles_post_ra>
// kernel: tpu_custom_call.1
= control target key start
LH: loop header
LB: loop body
LE: loop exit
PB: predicated region body
PF: predicated region fallthrough
CT: control target
= control target key end

     0   :  { %10 = vsyncpa [#allocation3], 0  ;;  %s1589_s0 = inlined_call_operand.vmem [shape: f32[8,16,8], index: 0, kind: input, shape index: {}]   ;;  %s1590_s1 = inlined_call_operand.vmem [shape: f32[8,64], index: 1, kind: input, shape index: {}]   ;;  %s1591_s2 = inlined_call_operand.vmem [shape: f32[4,64,32], index: 2, kind: input, shape index: {}]   ;;  %s1592_s3 = inlined_call_operand.vmem [shape: f32[32,128], index: 3, kind: input, shape index: {}]   ;;  %s1593_s4 = inlined_call_operand.vmem [shape: f32[8,128], index: 4, kind: input, shape index: {}]   ;;  %s1594_s5 = inlined_call_operand.hbm [shape: f32[2,4,128], index: 5, kind: output, shape index: {}]  }
   0x1   :  { %12 = vsyncpa [#allocation3 + $0x1], 0  ;;  %s1285_s18 = smov 0   ;;  %s1287_s19 = smov 0  }
   0x2   :  { %s1289_s20 = smov 0   ;;  %s1291_s21 = smov 0  }
   0x3 LB: > { %s1057_s22 = sadd.s32 4294967295, %s1253_s21   ;;  %s1058_s23 = sadd.s32 4294967294, %s1253_s21   ;;  %s1253_s21 = sphi %s1291_s21, %s1600_s21   ;;  %s1249_s20 = sphi %s1289_s20, %s1599_s20   ;;  %s1245_s19 = sphi %s1287_s19, %s1598_s19   ;;  %s1241_s18 = sphi %s1285_s18, %s1597_s18  }
   0x4   : > { %s1308_s24 = sadd.s32 1, %s1253_s21   ;;  %s135_s25 = sadd.s32 1, %s1249_s20 }
   0x5   : > { %s132_s26 = ssub.s32 %s1253_s21, %s1308_s24  ;;  %p145_p0 = scmp.ne.s32.totalorder %s1249_s20, %s1245_s19 }
   0x6   : > { %p133_p1 = scmp.eq.s32.totalorder %s132_s26, 0  ;;  %p146_p2 = scmp.eq.s32.totalorder %s1057_s22, 1 }
   0x7   : > { %p151_p3 = scmp.ne.s32.totalorder %s1245_s19, %s1241_s18  ;;  %p152_p4 = scmp.eq.s32.totalorder %s1058_s23, 1 }
   0x8   : > { %s1318_s27 = scalar_select %p133_p1, %s1249_s20, %s135_s25  }
   0x9   : > { %p1320_p5 = por %p146_p2, %p145_p0  ;;  %p1324_p6 = por %p152_p4, %p151_p3 }
   0xa   : > { %p1061_p7 = scmp.ge.s32.totalorder %s1253_s21, 1  ;;  %p192_p8 = scmp.lt.s32.totalorder %s1253_s21, 3 }
   0xc   : > { %p193_p9 = pnand %p1061_p7, %p192_p8 }
   0xd   : > { %s1333_s7 = sshll.u32 (!%p193_p9), %s1057_s22, 2  ;;  %s218_s6 = sand.u32 (!%p193_p9), 1, %s1245_s19  }
   0xe   : > { %196 = sbr.rel (%p193_p9) target bundleno = 1015 (0x3f7), region = 40  ;;  %p222_p10 = scmp.lt.s32.totalorder (!%p193_p9), %s1333_s7, 7 }
   0xf   : > { %s994_s11 = scalar_lea.hbm (!%p193_p9), %s1594_s5, %s1333_s7  ;;  %s984_s15 = scalar_lea.sflag (!%p193_p9), [#allocation3], %s218_s6 }
  0x10   : > { %s998_s14 = sshll.u32 (!%p193_p9), %s994_s11, 4  ;;  %s1211_s23 = scalar_lea.hbm (!%p193_p9), %s1594_s5, 8  ;;  %s999_s14 = int_to_ptr.hbm [resolvable:$true] %s998_s14 }
  0x11   : > { %s1205_s16 = sshra.s32 (!%p193_p9), %s999_s14, 4  ;;  %s1206_s16 = int_to_ptr.hbm [resolvable:$true] %s1205_s16 }
  0x12   : > { %s1207_s17 = scalar_lea.hbm (!%p193_p9), %s1206_s16, 4  ;;  %p1212_p0 = scmp.lt.s32.totalorder (!%p193_p9), %s1206_s16, %s1594_s5 }
  0x13   : > { %v237_v0 = vld [vmem:[%s1590_s1] sm:$0xff]  ;;  %s223_s8 = scalar_select %p222_p10, %s1333_s7, 7  ;;  %vm239_vm0 = vcmask 64512   ;;  %v320_v5 = vld [vmem:[%s1591_s2 + $0x38] sm:$0xff]  ;;  %v319_v6 = vld [vmem:[%s1591_s2 + $0x30] sm:$0xff]  ;;  %vm322_vm1 = vcmask 523264  }
  0x14   : > { %279 = vmatpush.msra.mxu0 %v237_v0  ;;  %1139 = vmatpush.msra.mxu2 %v237_v0  ;;  %v318_v7 = vld [vmem:[%s1591_s2 + $0x28] sm:$0xff]  ;;  %v317_v8 = vld [vmem:[%s1591_s2 + $0x20] sm:$0xff]  ;;  %v316_v10 = vld [vmem:[%s1591_s2 + $0x18] sm:$0xff]  ;;  %vm397_vm2 = vcmask 261120   ;;  %vm442_vm3 = vcmask 1041409   ;;  %vm444_vm4 = vcmask 1042434   ;;  %p1208_p11 = scmp.ne.s32.totalorder %s1206_s16, %s1207_s17  ;;  %p1213_p1 = scmp.lt.s32.totalorder %s1211_s23, %s1207_s17 }
  0x15   : > { %s1138_s9 = sshll.u32 %s223_s8, 4  ;;  %1140 = vmatpush.msra.mxu1 %v320_v5  ;;  %v315_v14 = vld [vmem:[%s1591_s2 + $0x10] sm:$0xff]  ;;  %v314_v15 = vld [vmem:[%s1591_s2 + $0x8] sm:$0xff]  ;;  %v313_v16 = vld [vmem:[%s1591_s2] sm:$0xff]  ;;  %vm446_vm5 = vcmask 1043459   ;;  %s1062_s8 = sshll.u32 %s218_s6, 2 }
  0x16   : > { %s226_s12 = scalar_lea.vmem %s1589_s0, %s1138_s9  ;;  %355 = vmatpush.msrb.mxu0 %v320_v5  ;;  %v1375_v17 = vld [vmem:[%s1593_s4] sm:$0xff]  ;;  %v1085_v31 = vld [vmem:[%s1591_s2 + $0x58] sm:$0xff]  ;;  %v1084_v44 = vld [vmem:[%s1591_s2 + $0x50] sm:$0xff]  ;;  %s220_s13 = scalar_lea.vmem [#allocation2], %s1062_s8 }
  0x17   : > { %v229_v1 = vld [vmem:[%s226_s12] sm:$0xff]  ;;  %v230_v2 = vld [vmem:[%s226_s12 + $0x8] sm:$0xff]  ;;  %v231_v3 = vld [vmem:[%s226_s12 + $0x10] sm:$0xff]  ;;  %1141 = vmatpush.msra.mxu1 %v319_v6  ;;  %v238_v18 = vperm.slane %v1375_v17, 0  ;;  %1148 = vmatpush.msra.mxu3 %v1085_v31  ;;  %v321_v47 = vperm.slane %v1375_v17, 1  ;;  %p1209_p12 = pnand %p1208_p11, %p1320_p5  ;;  %p1214_p2 = por %p1213_p1, %p1212_p0 }
  0x18   : > { %1066 = vmatmul.msk.f32.vlgmr.msra.gmra.mxu0 %vm239_vm0, %v229_v1  ;;  %v236_v4 = vld [vmem:[%s226_s12 + $0x38] sm:$0xff]  ;;  %v233_v11 = vld [vmem:[%s226_s12 + $0x20] sm:$0xff]  ;;  %v234_v12 = vld [vmem:[%s226_s12 + $0x28] sm:$0xff] }
  0x19   : > { %1073 = vmatmul.msk.f32.vlgmr.msra.gmra.mxu2 %vm239_vm0, %v236_v4  ;;  %356 = vmatpush.msrb.mxu0 %v319_v6  ;;  %v232_v9 = vld [vmem:[%s226_s12 + $0x18] sm:$0xff]  ;;  %v235_v13 = vld [vmem:[%s226_s12 + $0x30] sm:$0xff]  ;;  %v1083_v45 = vld [vmem:[%s1591_s2 + $0x48] sm:$0xff]  ;;  %s996_s12 = sshll.u32 %s220_s13, 4  ;;  %p1210_p13 = pneg %p1209_p12  ;;  %s997_s12 = int_to_ptr.vmem [resolvable:$true] %s996_s12 }
  0x1a   : > { %1142 = vmatpush.msra.mxu1 %v318_v7  ;;  %1149 = vmatpush.msra.mxu3 %v1084_v44  ;;  %v1082_v46 = vld [vmem:[%s1591_s2 + $0x40] sm:$0xff]  ;;  %v1089_v63 = vld [vmem:[%s1591_s2 + $0x78] sm:$0xff]  ;;  %v1088_v0 = vld [vmem:[%s1591_s2 + $0x70] sm:$0xff] }
  0x1b   : > { %357 = vmatpush.msrb.mxu0 %v318_v7  ;;  %462 = vmatpush.msrb.mxu2 %v1089_v63  ;;  %v1086_v7 = vld [vmem:[%s1591_s2 + $0x60] sm:$0xff]  ;;  %p1215_p3 = pnand %p1214_p2, %p1210_p13 }
  0x1c   : > { %1143 = vmatpush.msra.mxu1 %v317_v8  ;;  %1150 = vmatpush.msra.mxu3 %v1083_v45 }
  0x1d   : > { %358 = vmatpush.msrb.mxu0 %v317_v8  ;;  %463 = vmatpush.msrb.mxu2 %v1088_v0  ;;  %v1103_v0 = vld [vmem:[%s1591_s2 + $0xa0] sm:$0xff] }
  0x1e   : > { %1144 = vmatpush.msra.mxu1 %v316_v10  ;;  %1151 = vmatpush.msra.mxu3 %v1082_v46 }
  0x1f   : > { %359 = vmatpush.msrb.mxu0 %v316_v10 }
  0x20   : > { %1067 = vmatmul.msk.f32.gmra.mxu0 %vm239_vm0, %v230_v2  ;;  %1145 = vmatpush.msra.mxu1 %v315_v14  ;;  %v1087_v2 = vld [vmem:[%s1591_s2 + $0x68] sm:$0xff] }
  0x21   : > { %360 = vmatpush.msrb.mxu0 %v315_v14  ;;  %464 = vmatpush.msrb.mxu2 %v1087_v2  ;;  %v1102_v2 = vld [vmem:[%s1591_s2 + $0x98] sm:$0xff] }
  0x22   : > { %1146 = vmatpush.msra.mxu1 %v314_v15 }
  0x23   : > { %361 = vmatpush.msrb.mxu0 %v314_v15  ;;  %465 = vmatpush.msrb.mxu2 %v1086_v7  ;;  %v1099_v7 = vld [vmem:[%s1591_s2 + $0x80] sm:$0xff] }
  0x24   : > { %1147 = vmatpush.msra.mxu1 %v313_v16 }
  0x25   : > { %362 = vmatpush.msrb.mxu0 %v313_v16 }
  0x26   : > { %515 = vmatpush.msrb.mxu1 %v1085_v31 }
  0x28   : > { %1068 = vmatmul.msk.f32.gmra.mxu0 %vm239_vm0, %v231_v3  ;;  %516 = vmatpush.msrb.mxu1 %v1084_v44 }
  0x2a   : > { %517 = vmatpush.msrb.mxu1 %v1083_v45 }
  0x2c   : > { %518 = vmatpush.msrb.mxu1 %v1082_v46 }
  0x30   : > { %1069 = vmatmul.msk.f32.gmra.mxu0 %vm239_vm0, %v232_v9 }
  0x38   : > { %1070 = vmatmul.msk.f32.gmra.mxu0 %vm239_vm0, %v233_v11 }
  0x40   : > { %1071 = vmatmul.msk.f32.gmra.mxu0 %vm239_vm0, %v234_v12 }
  0x48   : > { %1072 = vmatmul.msk.f32.gmra.mxu0 %vm239_vm0, %v235_v13 }
  0x95   : > { %v281_v19 = vpop.f32.mrf.mxu0 }
  0x96   : > { %v282_v20 = vadd.f32 %v281_v19, %v238_v18 }
  0x98   : > { %v305_v21 = vmax.f32 %v282_v20, 0.0 }
  0x9a   : > { %1074 = vmatmul.msk.f32.vlgmr.msrb.gmra.mxu0 %vm322_vm1, %v305_v21 }
  0x9c   : > { %v302_v40 = vpop.f32.mrf.mxu2 }
  0x9d   : > { %v284_v22 = vpop.f32.mrf.mxu0  ;;  %v303_v42 = vadd.f32 %v302_v40, %v238_v18 }
  0x9e   : > { %v285_v23 = vadd.f32 %v284_v22, %v238_v18 }
  0x9f   : > { %v312_v43 = vmax.f32 %v303_v42, 0.0 }
  0xa0   : > { %v306_v24 = vmax.f32 %v285_v23, 0.0 }
  0xa2   : > { %1075 = vmatmul.msk.f32.gmra.mxu0 %vm322_vm1, %v306_v24 }
  0xa5   : > { %v287_v25 = vpop.f32.mrf.mxu0 }
  0xa6   : > { %v288_v26 = vadd.f32 %v287_v25, %v238_v18 }
  0xa8   : > { %v307_v27 = vmax.f32 %v288_v26, 0.0 }
  0xaa   : > { %1076 = vmatmul.msk.f32.gmra.mxu0 %vm322_vm1, %v307_v27 }
  0xad   : > { %v290_v28 = vpop.f32.mrf.mxu0 }
  0xae   : > { %v291_v29 = vadd.f32 %v290_v28, %v238_v18 }
  0xb0   : > { %v308_v30 = vmax.f32 %v291_v29, 0.0 }
  0xb2   : > { %1077 = vmatmul.msk.f32.vlgmr.msra.gmra.mxu1 %vm322_vm1, %v308_v30 }
  0xb5   : > { %v293_v32 = vpop.f32.mrf.mxu0 }
  0xb6   : > { %v294_v33 = vadd.f32 %v293_v32, %v238_v18 }
  0xb8   : > { %v309_v34 = vmax.f32 %v294_v33, 0.0 }
  0xba   : > { %1078 = vmatmul.msk.f32.gmra.mxu1 %vm322_vm1, %v309_v34 }
  0xbd   : > { %v296_v35 = vpop.f32.mrf.mxu0 }
  0xbe   : > { %v297_v36 = vadd.f32 %v296_v35, %v238_v18 }
  0xc0   : > { %v310_v37 = vmax.f32 %v297_v36, 0.0 }
  0xc2   : > { %1079 = vmatmul.msk.f32.gmra.mxu1 %vm322_vm1, %v310_v37 }
  0xc5   : > { %v299_v38 = vpop.f32.mrf.mxu0 }
  0xc6   : > { %v300_v39 = vadd.f32 %v299_v38, %v238_v18 }
  0xc8   : > { %v311_v41 = vmax.f32 %v300_v39, 0.0 }
  0xca   : > { %1080 = vmatmul.msk.f32.gmra.mxu1 %vm322_vm1, %v311_v41 }
  0xd2   : > { %1081 = vmatmul.msk.f32.gmra.mxu1 %vm322_vm1, %v312_v43 }
 0x117   : > { %v364_v48 = vpop.f32.mrf.mxu0 }
 0x118   : > { %v365_v49 = vadd.f32 %v364_v48, %v321_v47 }
 0x11a   : > { %v470_v50 = vmax.f32 %v365_v49, 0.0  ;;  %v398_v9 = vsel %vm397_vm2, %v365_v49, -inf }
 0x11c   : > { %1091 = vmatmul.msk.f32.vlgmr.msrb.gmra.mxu1 %vm397_vm2, %v470_v50 }
 0x11f   : > { %v367_v51 = vpop.f32.mrf.mxu0 }
 0x120   : > { %v368_v52 = vadd.f32 %v367_v51, %v321_v47 }
 0x122   : > { %v471_v53 = vmax.f32 %v368_v52, 0.0  ;;  %v399_v4 = vsel %vm397_vm2, %v368_v52, -inf }
 0x123   : > { %v400_v13 = vmax.f32 %v398_v9, %v399_v4  ;;  %v478_v4 = vperm.slane %v1375_v17, 2 }
 0x124   : > { %1092 = vmatmul.msk.f32.gmra.mxu1 %vm397_vm2, %v471_v53 }
 0x125   : > { %v401_v18 = vrot.slane %v400_v13, 4 }
 0x127   : > { %v370_v54 = vpop.f32.mrf.mxu0  ;;  %v402_v24 = vmax.f32 %v400_v13, %v401_v18 }
 0x128   : > { %v371_v55 = vadd.f32 %v370_v54, %v321_v47 }
 0x129   : > { %v403_v27 = vrot.slane %v402_v24, 2 }
 0x12a   : > { %v472_v56 = vmax.f32 %v371_v55, 0.0  ;;  %v407_v5 = vsel %vm397_vm2, %v371_v55, -inf }
 0x12b   : > { %v404_v35 = vmax.f32 %v402_v24, %v403_v27 }
 0x12c   : > { %1093 = vmatmul.msk.f32.gmra.mxu1 %vm397_vm2, %v472_v56 }
 0x12d   : > { %v405_v40 = vrot.slane %v404_v35, 1 }
 0x12f   : > { %v373_v57 = vpop.f32.mrf.mxu1  ;;  %v406_v45 = vmax.f32 %v404_v35, %v405_v40 }
 0x130   : > { %v374_v58 = vadd.f32 %v373_v57, %v321_v47 }
 0x131   : > { %v434_v50 = vmax.f32 %v406_v45, 0.0 }
 0x132   : > { %v473_v59 = vmax.f32 %v374_v58, 0.0  ;;  %v408_v1 = vsel %vm397_vm2, %v374_v58, -inf }
 0x133   : > { %v409_v8 = vmax.f32 %v407_v5, %v408_v1  ;;  %v1100_v5 = vld [vmem:[%s1591_s2 + $0x88] sm:$0xff] }
 0x134   : > { %1094 = vmatmul.msk.f32.gmra.mxu1 %vm397_vm2, %v473_v59 }
 0x135   : > { %v410_v15 = vrot.slane %v409_v8, 4 }
 0x137   : > { %v376_v60 = vpop.f32.mrf.mxu1  ;;  %v411_v21 = vmax.f32 %v409_v8, %v410_v15 }
 0x138   : > { %v377_v61 = vadd.f32 %v376_v60, %v321_v47  ;;  %v1106_v60 = vld [vmem:[%s1591_s2 + $0xb8] sm:$0xff] }
 0x139   : > { %v412_v25 = vrot.slane %v411_v21, 2  ;;  %634 = vmatpush.msra.mxu2 %v1106_v60 }
 0x13a   : > { %v474_v62 = vmax.f32 %v377_v61, 0.0  ;;  %v416_v10 = vsel %vm397_vm2, %v377_v61, -inf  ;;  %v1105_v61 = vld [vmem:[%s1591_s2 + $0xb0] sm:$0xff] }
 0x13b   : > { %v413_v30 = vmax.f32 %v411_v21, %v412_v25  ;;  %635 = vmatpush.msra.mxu2 %v1105_v61 }
 0x13c   : > { %1095 = vmatmul.msk.f32.gmra.mxu1 %vm397_vm2, %v474_v62  ;;  %v1104_v62 = vld [vmem:[%s1591_s2 + $0xa8] sm:$0xff] }
 0x13d   : > { %v414_v37 = vrot.slane %v413_v30, 1  ;;  %636 = vmatpush.msra.mxu2 %v1104_v62 }
 0x13f   : > { %v379_v3 = vpop.f32.mrf.mxu1  ;;  %v415_v42 = vmax.f32 %v413_v30, %v414_v37  ;;  %637 = vmatpush.msra.mxu2 %v1103_v0 }
 0x140   : > { %v380_v6 = vadd.f32 %v379_v3, %v321_v47  ;;  %v1101_v3 = vld [vmem:[%s1591_s2 + $0x90] sm:$0xff] }
 0x142   : > { %v417_v11 = vsel %vm397_vm2, %v380_v6, -inf  ;;  %v475_v12 = vmax.f32 %v380_v6, 0.0 }
 0x143   : > { %v418_v14 = vmax.f32 %v416_v10, %v417_v11 }
 0x144   : > { %1096 = vmatmul.msk.f32.vlgmr.msra.gmra.mxu3 %vm397_vm2, %v475_v12 }
 0x145   : > { %v419_v16 = vrot.slane %v418_v14, 4 }
 0x147   : > { %v382_v19 = vpop.f32.mrf.mxu1  ;;  %v420_v22 = vmax.f32 %v418_v14, %v419_v16 }
 0x148   : > { %v383_v20 = vadd.f32 %v382_v19, %v321_v47 }
 0x149   : > { %v421_v26 = vrot.slane %v420_v22, 2 }
 0x14a   : > { %v476_v23 = vmax.f32 %v383_v20, 0.0  ;;  %v425_v32 = vsel %vm397_vm2, %v383_v20, -inf }
 0x14b   : > { %v422_v31 = vmax.f32 %v420_v22, %v421_v26 }
 0x14c   : > { %1097 = vmatmul.msk.f32.gmra.mxu3 %vm397_vm2, %v476_v23 }
 0x14d   : > { %v423_v39 = vrot.slane %v422_v31, 1 }
 0x14f   : > { %v385_v28 = vpop.f32.mrf.mxu1  ;;  %v424_v44 = vmax.f32 %v422_v31, %v423_v39 }
 0x150   : > { %v386_v29 = vadd.f32 %v385_v28, %v321_v47  ;;  %v435_v47 = vmax.f32 %v415_v42, 0.0 }
 0x151   : > { %v436_v49 = vmax.f32 %v424_v44, 0.0 }
 0x152   : > { %v426_v33 = vsel %vm397_vm2, %v386_v29, -inf  ;;  %v477_v34 = vmax.f32 %v386_v29, 0.0  ;;  %v443_v53 = vsel %vm442_vm3, %v435_v47, %v434_v50 }
 0x153   : > { %v427_v36 = vmax.f32 %v425_v32, %v426_v33  ;;  %v445_v54 = vsel %vm444_vm4, %v436_v49, %v443_v53 }
 0x154   : > { %1098 = vmatmul.msk.f32.gmra.mxu3 %vm397_vm2, %v477_v34 }
 0x155   : > { %v428_v38 = vrot.slane %v427_v36, 4 }
 0x157   : > { %v429_v41 = vmax.f32 %v427_v36, %v428_v38 }
 0x159   : > { %v430_v43 = vrot.slane %v429_v41, 2 }
 0x15b   : > { %v431_v46 = vmax.f32 %v429_v41, %v430_v43 }
 0x15d   : > { %v432_v48 = vrot.slane %v431_v46, 1 }
 0x15f   : > { %v433_v51 = vmax.f32 %v431_v46, %v432_v48 }
 0x161   : > { %v437_v52 = vmax.f32 %v433_v51, 0.0 }
 0x163   : > { %v447_v55 = vsel %vm446_vm5, %v437_v52, %v445_v54 }
 0x164   : > { %1090 = vmatmul.msk.f32.vlgmr.msrb.gmra.mxu2 %vm397_vm2, %v447_v55 }
 0x165   : > { %687 = vmatpush.msrb.mxu2 %v1102_v2 }
 0x167   : > { %688 = vmatpush.msrb.mxu2 %v1101_v3 }
 0x169   : > { %689 = vmatpush.msrb.mxu2 %v1100_v5 }
 0x16b   : > { %690 = vmatpush.msrb.mxu2 %v1099_v7 }
 0x199   : > { %v520_v56 = vpop.f32.mrf.mxu1 }
 0x19a   : > { %v521_v8 = vadd.f32 %v520_v56, %v478_v4 }
 0x1a1   : > { %v523_v57 = vpop.f32.mrf.mxu1 }
 0x1a2   : > { %v524_v9 = vadd.f32 %v523_v57, %v478_v4 }
 0x1a9   : > { %v526_v58 = vpop.f32.mrf.mxu1 }
 0x1aa   : > { %v527_v16 = vadd.f32 %v526_v58, %v478_v4 }
 0x1b1   : > { %v529_v63 = vpop.f32.mrf.mxu1 }
 0x1b2   : > { %v530_v18 = vadd.f32 %v529_v63, %v478_v4 }
 0x1b9   : > { %v532_v6 = vpop.f32.mrf.mxu1 }
 0x1ba   : > { %v533_v19 = vadd.f32 %v532_v6, %v478_v4 }
 0x1c7   : > { %v535_v59 = vpop.f32.mrf.mxu3 }
 0x1c8   : > { %v536_v20 = vadd.f32 %v535_v59, %v478_v4 }
 0x1cf   : > { %v538_v1 = vpop.f32.mrf.mxu3 }
 0x1d0   : > { %v539_v25 = vadd.f32 %v538_v1, %v478_v4 }
 0x1d7   : > { %v541_v11 = vpop.f32.mrf.mxu3 }
 0x1d8   : > { %v542_v26 = vadd.f32 %v541_v11, %v478_v4 }
 0x1e7   : > { %v467_v10 = vpop.f32.mrf.mxu2 }
 0x1e8   : > { %v545_v12 = vrot.slane %v467_v10, 1  ;;  %v546_v13 = vrot.slane %v467_v10, 2  ;;  %v547_v14 = vrot.slane %v467_v10, 3  ;;  %v548_v15 = vperm.slane %v467_v10, 0 }
 0x1ea   : > { %v549_v21 = vperm.slane %v545_v12, 0  ;;  %v550_v22 = vperm.slane %v546_v13, 0  ;;  %v551_v23 = vperm.slane %v547_v14, 0  ;;  %v556_v24 = vadd.f32 %v548_v15, %v521_v8 }
 0x1eb   : > { %v557_v27 = vadd.f32 %v548_v15, %v524_v9 }
 0x1ec   : > { %v558_v28 = vadd.f32 %v549_v21, %v527_v16  ;;  %v559_v29 = vadd.f32 %v549_v21, %v530_v18  ;;  %v560_v30 = vadd.f32 %v550_v22, %v533_v19  ;;  %v561_v31 = vadd.f32 %v550_v22, %v536_v20  ;;  %v1119_v22 = vld [vmem:[%s1591_s2 + $0xd8] sm:$0xff] }
 0x1ed   : > { %v562_v32 = vadd.f32 %v551_v23, %v539_v25  ;;  %v563_v33 = vadd.f32 %v551_v23, %v542_v26  ;;  %v573_v34 = vsel %vm397_vm2, %v556_v24, -inf  ;;  %v574_v35 = vsel %vm397_vm2, %v557_v27, -inf  ;;  %859 = vmatpush.msrb.mxu3 %v1119_v22  ;;  %v1118_v23 = vld [vmem:[%s1591_s2 + $0xd0] sm:$0xff]  ;;  %v1116_v25 = vld [vmem:[%s1591_s2 + $0xc0] sm:$0xff] }
 0x1ee   : > { %v575_v36 = vmax.f32 %v573_v34, %v574_v35  ;;  %v582_v37 = vsel %vm397_vm2, %v558_v28, -inf  ;;  %v583_v38 = vsel %vm397_vm2, %v559_v29, -inf  ;;  %v591_v39 = vsel %vm397_vm2, %v560_v30, -inf }
 0x1ef   : > { %v584_v40 = vmax.f32 %v582_v37, %v583_v38  ;;  %v592_v41 = vsel %vm397_vm2, %v561_v31, -inf  ;;  %v600_v42 = vsel %vm397_vm2, %v562_v32, -inf  ;;  %v601_v43 = vsel %vm397_vm2, %v563_v33, -inf  ;;  %860 = vmatpush.msrb.mxu3 %v1118_v23 }
 0x1f0   : > { %v576_v44 = vrot.slane %v575_v36, 4  ;;  %v593_v45 = vmax.f32 %v591_v39, %v592_v41  ;;  %v602_v46 = vmax.f32 %v600_v42, %v601_v43  ;;  %v642_v13 = vmax.f32 %v556_v24, 0.0  ;;  %v1117_v24 = vld [vmem:[%s1591_s2 + $0xc8] sm:$0xff] }
 0x1f1   : > { %v585_v47 = vrot.slane %v584_v40, 4  ;;  %v643_v14 = vmax.f32 %v557_v27, 0.0  ;;  %v644_v15 = vmax.f32 %v558_v28, 0.0  ;;  %v645_v16 = vmax.f32 %v559_v29, 0.0  ;;  %861 = vmatpush.msrb.mxu3 %v1117_v24 }
 0x1f2   : > { %v577_v48 = vmax.f32 %v575_v36, %v576_v44  ;;  %v594_v49 = vrot.slane %v593_v45, 4  ;;  %v603_v50 = vrot.slane %v602_v46, 4  ;;  %v646_v18 = vmax.f32 %v560_v30, 0.0 }
 0x1f3   : > { %v586_v51 = vmax.f32 %v584_v40, %v585_v47  ;;  %v647_v19 = vmax.f32 %v561_v31, 0.0  ;;  %v648_v20 = vmax.f32 %v562_v32, 0.0  ;;  %v649_v21 = vmax.f32 %v563_v33, 0.0  ;;  %862 = vmatpush.msrb.mxu3 %v1116_v25 }
 0x1f4   : > { %v578_v52 = vrot.slane %v577_v48, 2  ;;  %v595_v53 = vmax.f32 %v593_v45, %v594_v49  ;;  %v604_v54 = vmax.f32 %v602_v46, %v603_v50  ;;  %v1489_v27 = vperm.slane %v1375_v17, 3  ;;  %v1123_v46 = vld [vmem:[%s1591_s2 + $0xf8] sm:$0xff] }
 0x1f5   : > { %v587_v55 = vrot.slane %v586_v51, 2  ;;  %806 = vmatpush.msra.mxu0 %v1123_v46 }
 0x1f6   : > { %v579_v56 = vmax.f32 %v577_v48, %v578_v52  ;;  %v596_v57 = vrot.slane %v595_v53, 2  ;;  %v605_v58 = vrot.slane %v604_v54, 2 }
 0x1f7   : > { %v588_v59 = vmax.f32 %v586_v51, %v587_v55  ;;  %v1122_v55 = vld [vmem:[%s1591_s2 + $0xf0] sm:$0xff] }
 0x1f8   : > { %v580_v60 = vrot.slane %v579_v56, 1  ;;  %v597_v61 = vmax.f32 %v595_v53, %v596_v57  ;;  %v606_v62 = vmax.f32 %v604_v54, %v605_v58  ;;  %807 = vmatpush.msra.mxu0 %v1122_v55 }
 0x1f9   : > { %v589_v63 = vrot.slane %v588_v59, 1 }
 0x1fa   : > { %v581_v0 = vmax.f32 %v579_v56, %v580_v60  ;;  %v598_v1 = vrot.slane %v597_v61, 1  ;;  %v607_v2 = vrot.slane %v606_v62, 1  ;;  %v1121_v56 = vld [vmem:[%s1591_s2 + $0xe8] sm:$0xff] }
 0x1fb   : > { %v590_v3 = vmax.f32 %v588_v59, %v589_v63  ;;  %v1120_v59 = vld [vmem:[%s1591_s2 + $0xe0] sm:$0xff]  ;;  %808 = vmatpush.msra.mxu0 %v1121_v56 }
 0x1fc   : > { %v599_v4 = vmax.f32 %v597_v61, %v598_v1  ;;  %v608_v5 = vmax.f32 %v606_v62, %v607_v2  ;;  %v609_v6 = vmax.f32 %v581_v0, 0.0 }
 0x1fd   : > { %v610_v7 = vmax.f32 %v590_v3, 0.0  ;;  %809 = vmatpush.msra.mxu0 %v1120_v59  ;;  %v949_v59 = vld [vmem:[%s1592_s3 + $0x8] sm:$0xff] }
 0x1fe   : > { %v611_v8 = vmax.f32 %v599_v4, 0.0  ;;  %v612_v9 = vmax.f32 %v608_v5, 0.0 }
 0x1ff   : > { %v617_v10 = vsel %vm442_vm3, %v610_v7, %v609_v6 }
 0x200   : > { %v618_v11 = vsel %vm444_vm4, %v611_v8, %v617_v10 }
 0x201   : > { %v619_v12 = vsel %vm446_vm5, %v612_v9, %v618_v11 }
 0x202   : > { %1107 = vmatmul.msk.f32.vlgmr.msra.gmra.mxu2 %vm397_vm2, %v619_v12 }
 0x20a   : > { %1108 = vmatmul.msk.f32.vlgmr.msrb.gmra.mxu2 %vm397_vm2, %v642_v13 }
 0x212   : > { %1109 = vmatmul.msk.f32.gmra.mxu2 %vm397_vm2, %v643_v14 }
 0x21a   : > { %1110 = vmatmul.msk.f32.gmra.mxu2 %vm397_vm2, %v644_v15 }
 0x222   : > { %1111 = vmatmul.msk.f32.gmra.mxu2 %vm397_vm2, %v645_v16 }
 0x22a   : > { %1112 = vmatmul.msk.f32.gmra.mxu2 %vm397_vm2, %v646_v18 }
 0x232   : > { %1113 = vmatmul.msk.f32.gmra.mxu2 %vm397_vm2, %v647_v19 }
 0x23a   : > { %1114 = vmatmul.msk.f32.gmra.mxu2 %vm397_vm2, %v648_v20 }
 0x242   : > { %1115 = vmatmul.msk.f32.gmra.mxu2 %vm397_vm2, %v649_v21 }
 0x285   : > { %v639_v26 = vpop.f32.mrf.mxu2 }
 0x286   : > { %v720_v30 = vperm.slane %v639_v26, 0  ;;  %v717_v37 = vrot.slane %v639_v26, 1  ;;  %v718_v48 = vrot.slane %v639_v26, 2  ;;  %v719_v0 = vrot.slane %v639_v26, 3 }
 0x288   : > { %v721_v40 = vperm.slane %v717_v37, 0  ;;  %v722_v51 = vperm.slane %v718_v48, 0  ;;  %v723_v11 = vperm.slane %v719_v0, 0 }
 0x28d   : > { %v692_v28 = vpop.f32.mrf.mxu2 }
 0x28e   : > { %v693_v29 = vadd.f32 %v692_v28, %v1489_v27 }
 0x290   : > { %v728_v31 = vadd.f32 %v720_v30, %v693_v29 }
 0x292   : > { %v814_v32 = vmax.f32 %v728_v31, 0.0  ;;  %v745_v1 = vsel %vm397_vm2, %v728_v31, -inf }
 0x294   : > { %1125 = vmatmul.msk.f32.vlgmr.msrb.gmra.mxu3 %vm397_vm2, %v814_v32 }
 0x295   : > { %v695_v33 = vpop.f32.mrf.mxu2 }
 0x296   : > { %v696_v34 = vadd.f32 %v695_v33, %v1489_v27 }
 0x298   : > { %v729_v35 = vadd.f32 %v720_v30, %v696_v34 }
 0x29a   : > { %v815_v36 = vmax.f32 %v729_v35, 0.0  ;;  %v746_v60 = vsel %vm397_vm2, %v729_v35, -inf }
 0x29b   : > { %v747_v5 = vmax.f32 %v745_v1, %v746_v60  ;;  %v948_v60 = vld [vmem:[%s1592_s3] sm:$0xff] }
 0x29c   : > { %1126 = vmatmul.msk.f32.gmra.mxu3 %vm397_vm2, %v815_v36 }
 0x29d   : > { %v698_v38 = vpop.f32.mrf.mxu2  ;;  %v748_v12 = vrot.slane %v747_v5, 4 }
 0x29e   : > { %v699_v39 = vadd.f32 %v698_v38, %v1489_v27 }
 0x29f   : > { %v749_v18 = vmax.f32 %v747_v5, %v748_v12 }
 0x2a0   : > { %v730_v41 = vadd.f32 %v721_v40, %v699_v39 }
 0x2a1   : > { %v750_v23 = vrot.slane %v749_v18, 2 }
 0x2a2   : > { %v816_v42 = vmax.f32 %v730_v41, 0.0  ;;  %v754_v61 = vsel %vm397_vm2, %v730_v41, -inf }
 0x2a3   : > { %v751_v31 = vmax.f32 %v749_v18, %v750_v23 }
 0x2a4   : > { %1127 = vmatmul.msk.f32.gmra.mxu3 %vm397_vm2, %v816_v42 }
 0x2a5   : > { %v701_v43 = vpop.f32.mrf.mxu2  ;;  %v752_v36 = vrot.slane %v751_v31, 1 }
 0x2a6   : > { %v702_v44 = vadd.f32 %v701_v43, %v1489_v27 }
 0x2a8   : > { %v731_v45 = vadd.f32 %v721_v40, %v702_v44  ;;  %v753_v40 = vmax.f32 %v751_v31, %v752_v36 }
 0x2aa   : > { %v817_v47 = vmax.f32 %v731_v45, 0.0  ;;  %v755_v57 = vsel %vm397_vm2, %v731_v45, -inf  ;;  %v781_v45 = vmax.f32 %v753_v40, 0.0 }
 0x2ab   : > { %v756_v63 = vmax.f32 %v754_v61, %v755_v57  ;;  %v951_v57 = vld [vmem:[%s1592_s3 + $0x18] sm:$0xff] }
 0x2ac   : > { %1128 = vmatmul.msk.f32.gmra.mxu3 %vm397_vm2, %v817_v47  ;;  %974 = vmatpush.msrb.mxu0 %v951_v57 }
 0x2ad   : > { %v704_v49 = vpop.f32.mrf.mxu2  ;;  %v757_v7 = vrot.slane %v756_v63, 4 }
 0x2ae   : > { %v705_v50 = vadd.f32 %v704_v49, %v1489_v27 }
 0x2af   : > { %v758_v14 = vmax.f32 %v756_v63, %v757_v7 }
 0x2b0   : > { %v732_v52 = vadd.f32 %v722_v51, %v705_v50 }
 0x2b1   : > { %v759_v19 = vrot.slane %v758_v14, 2 }
 0x2b2   : > { %v818_v53 = vmax.f32 %v732_v52, 0.0  ;;  %v763_v2 = vsel %vm397_vm2, %v732_v52, -inf }
 0x2b3   : > { %v760_v25 = vmax.f32 %v758_v14, %v759_v19 }
 0x2b4   : > { %1129 = vmatmul.msk.f32.gmra.mxu3 %vm397_vm2, %v818_v53 }
 0x2b5   : > { %v707_v54 = vpop.f32.mrf.mxu2  ;;  %v761_v33 = vrot.slane %v760_v25, 1 }
 0x2b6   : > { %v708_v58 = vadd.f32 %v707_v54, %v1489_v27 }
 0x2b7   : > { %v762_v38 = vmax.f32 %v760_v25, %v761_v33 }
 0x2b8   : > { %v733_v62 = vadd.f32 %v722_v51, %v708_v58  ;;  %v950_v58 = vld [vmem:[%s1592_s3 + $0x10] sm:$0xff] }
 0x2b9   : > { %v782_v42 = vmax.f32 %v762_v38, 0.0  ;;  %975 = vmatpush.msrb.mxu0 %v950_v58 }
 0x2ba   : > { %v764_v3 = vsel %vm397_vm2, %v733_v62, -inf  ;;  %v819_v4 = vmax.f32 %v733_v62, 0.0  ;;  %v822_v62 = vperm.slane %v1375_v17, 4 }
 0x2bb   : > { %v765_v6 = vmax.f32 %v763_v2, %v764_v3  ;;  %v789_v48 = vsel %vm442_vm3, %v782_v42, %v781_v45  ;;  %976 = vmatpush.msrb.mxu0 %v949_v59 }
 0x2bc   : > { %1130 = vmatmul.msk.f32.gmra.mxu3 %vm397_vm2, %v819_v4 }
 0x2bd   : > { %v710_v8 = vpop.f32.mrf.mxu2  ;;  %v766_v9 = vrot.slane %v765_v6, 4  ;;  %977 = vmatpush.msrb.mxu0 %v948_v60 }
 0x2be   : > { %v711_v10 = vadd.f32 %v710_v8, %v1489_v27 }
 0x2bf   : > { %v767_v15 = vmax.f32 %v765_v6, %v766_v9 }
 0x2c0   : > { %v734_v13 = vadd.f32 %v723_v11, %v711_v10 }
 0x2c1   : > { %v768_v21 = vrot.slane %v767_v15, 2 }
 0x2c2   : > { %v820_v16 = vmax.f32 %v734_v13, 0.0  ;;  %v772_v28 = vsel %vm397_vm2, %v734_v13, -inf }
 0x2c3   : > { %v769_v26 = vmax.f32 %v767_v15, %v768_v21 }
 0x2c4   : > { %1131 = vmatmul.msk.f32.gmra.mxu3 %vm397_vm2, %v820_v16 }
 0x2c5   : > { %v713_v20 = vpop.f32.mrf.mxu2  ;;  %v770_v35 = vrot.slane %v769_v26, 1 }
 0x2c6   : > { %v714_v22 = vadd.f32 %v713_v20, %v1489_v27 }
 0x2c7   : > { %v771_v39 = vmax.f32 %v769_v26, %v770_v35 }
 0x2c8   : > { %v735_v24 = vadd.f32 %v723_v11, %v714_v22 }
 0x2c9   : > { %v783_v44 = vmax.f32 %v771_v39, 0.0 }
 0x2ca   : > { %v773_v29 = vsel %vm397_vm2, %v735_v24, -inf  ;;  %v821_v30 = vmax.f32 %v735_v24, 0.0 }
 0x2cb   : > { %v774_v32 = vmax.f32 %v772_v28, %v773_v29  ;;  %v790_v49 = vsel %vm444_vm4, %v783_v44, %v789_v48 }
 0x2cc   : > { %1132 = vmatmul.msk.f32.gmra.mxu3 %vm397_vm2, %v821_v30 }
 0x2cd   : > { %v775_v34 = vrot.slane %v774_v32, 4 }
 0x2cf   : > { %v776_v37 = vmax.f32 %v774_v32, %v775_v34 }
 0x2d1   : > { %v777_v27 = vrot.slane %v776_v37, 2 }
 0x2d3   : > { %v778_v41 = vmax.f32 %v776_v37, %v777_v27 }
 0x2d5   : > { %v779_v43 = vrot.slane %v778_v41, 1 }
 0x2d7   : > { %v780_v46 = vmax.f32 %v778_v41, %v779_v43 }
 0x2d9   : > { %v784_v47 = vmax.f32 %v780_v46, 0.0 }
 0x2db   : > { %v791_v50 = vsel %vm446_vm5, %v784_v47, %v790_v49 }
 0x2dc   : > { %1124 = vmatmul.msk.f32.vlgmr.msra.gmra.mxu0 %vm397_vm2, %v791_v50 }
 0x317   : > { %v864_v51 = vpop.f32.mrf.mxu3 }
 0x318   : > { %v865_v63 = vadd.f32 %v864_v51, %v822_v62 }
 0x31f   : > { %v867_v52 = vpop.f32.mrf.mxu3 }
 0x320   : > { %v868_v0 = vadd.f32 %v867_v52, %v822_v62 }
 0x327   : > { %v870_v53 = vpop.f32.mrf.mxu3 }
 0x328   : > { %v871_v7 = vadd.f32 %v870_v53, %v822_v62 }
 0x32f   : > { %v873_v54 = vpop.f32.mrf.mxu3 }
 0x330   : > { %v874_v8 = vadd.f32 %v873_v54, %v822_v62 }
 0x337   : > { %v876_v55 = vpop.f32.mrf.mxu3 }
 0x338   : > { %v877_v9 = vadd.f32 %v876_v55, %v822_v62 }
 0x33f   : > { %v879_v56 = vpop.f32.mrf.mxu3 }
 0x340   : > { %v880_v10 = vadd.f32 %v879_v56, %v822_v62 }
 0x347   : > { %v882_v61 = vpop.f32.mrf.mxu3 }
 0x348   : > { %v883_v15 = vadd.f32 %v882_v61, %v822_v62 }
 0x34f   : > { %v885_v2 = vpop.f32.mrf.mxu3 }
 0x350   : > { %v886_v16 = vadd.f32 %v885_v2, %v822_v62 }
 0x359   : > { %v811_v1 = vpop.f32.mrf.mxu0 }
 0x35a   : > { %v889_v3 = vrot.slane %v811_v1, 1  ;;  %v890_v4 = vrot.slane %v811_v1, 2  ;;  %v891_v5 = vrot.slane %v811_v1, 3  ;;  %v892_v6 = vperm.slane %v811_v1, 0 }
 0x35c   : > { %v893_v11 = vperm.slane %v889_v3, 0  ;;  %v894_v12 = vperm.slane %v890_v4, 0  ;;  %v895_v13 = vperm.slane %v891_v5, 0  ;;  %v900_v14 = vadd.f32 %v892_v6, %v865_v63 }
 0x35d   : > { %v901_v18 = vadd.f32 %v892_v6, %v868_v0  ;;  %v952_v4 = vperm.slane %v1375_v17, 5 }
 0x35e   : > { %v902_v19 = vadd.f32 %v893_v11, %v871_v7  ;;  %v903_v20 = vadd.f32 %v893_v11, %v874_v8  ;;  %v904_v21 = vadd.f32 %v894_v12, %v877_v9  ;;  %v905_v22 = vadd.f32 %v894_v12, %v880_v10 }
 0x35f   : > { %v906_v23 = vadd.f32 %v895_v13, %v883_v15  ;;  %v907_v24 = vadd.f32 %v895_v13, %v886_v16  ;;  %v908_v25 = vsel %vm397_vm2, %v900_v14, -inf  ;;  %v909_v26 = vsel %vm397_vm2, %v901_v18, -inf }
 0x360   : > { %v910_v28 = vmax.f32 %v908_v25, %v909_v26  ;;  %v917_v29 = vsel %vm397_vm2, %v902_v19, -inf  ;;  %v918_v30 = vsel %vm397_vm2, %v903_v20, -inf  ;;  %v926_v31 = vsel %vm397_vm2, %v904_v21, -inf }
 0x361   : > { %v919_v32 = vmax.f32 %v917_v29, %v918_v30  ;;  %v927_v33 = vsel %vm397_vm2, %v905_v22, -inf  ;;  %v935_v34 = vsel %vm397_vm2, %v906_v23, -inf  ;;  %v936_v35 = vsel %vm397_vm2, %v907_v24, -inf }
 0x362   : > { %v911_v36 = vrot.slane %v910_v28, 4  ;;  %v928_v37 = vmax.f32 %v926_v31, %v927_v33  ;;  %v937_v38 = vmax.f32 %v935_v34, %v936_v35 }
 0x363   : > { %v920_v27 = vrot.slane %v919_v32, 4 }
 0x364   : > { %v912_v39 = vmax.f32 %v910_v28, %v911_v36  ;;  %v929_v40 = vrot.slane %v928_v37, 4  ;;  %v938_v41 = vrot.slane %v937_v38, 4 }
 0x365   : > { %v921_v42 = vmax.f32 %v919_v32, %v920_v27 }
 0x366   : > { %v913_v43 = vrot.slane %v912_v39, 2  ;;  %v930_v44 = vmax.f32 %v928_v37, %v929_v40  ;;  %v939_v45 = vmax.f32 %v937_v38, %v938_v41 }
 0x367   : > { %v922_v46 = vrot.slane %v921_v42, 2 }
 0x368   : > { %v914_v47 = vmax.f32 %v912_v39, %v913_v43  ;;  %v931_v48 = vrot.slane %v930_v44, 2  ;;  %v940_v49 = vrot.slane %v939_v45, 2 }
 0x369   : > { %v923_v50 = vmax.f32 %v921_v42, %v922_v46 }
 0x36a   : > { %v915_v51 = vrot.slane %v914_v47, 1  ;;  %v932_v52 = vmax.f32 %v930_v44, %v931_v48  ;;  %v941_v53 = vmax.f32 %v939_v45, %v940_v49 }
 0x36b   : > { %v924_v54 = vrot.slane %v923_v50, 1 }
 0x36c   : > { %v916_v55 = vmax.f32 %v914_v47, %v915_v51  ;;  %v933_v56 = vrot.slane %v932_v52, 1  ;;  %v942_v57 = vrot.slane %v941_v53, 1 }
 0x36d   : > { %v925_v58 = vmax.f32 %v923_v50, %v924_v54 }
 0x36e   : > { %v934_v59 = vmax.f32 %v932_v52, %v933_v56  ;;  %v943_v60 = vmax.f32 %v941_v53, %v942_v57  ;;  %v944_v61 = vmax.f32 %v916_v55, 0.0 }
 0x36f   : > { %v945_v62 = vmax.f32 %v925_v58, 0.0 }
 0x370   : > { %v946_v63 = vmax.f32 %v934_v59, 0.0  ;;  %v947_v0 = vmax.f32 %v943_v60, 0.0 }
 0x371   : > { %v957_v1 = vsel %vm442_vm3, %v945_v62, %v944_v61 }
 0x372   : > { %v958_v2 = vsel %vm444_vm4, %v946_v63, %v957_v1 }
 0x373   : > { %v959_v3 = vsel %vm446_vm5, %v947_v0, %v958_v2 }
 0x374   : > { %1133 = vmatmul.msk.f32.vlgmr.msrb.gmra.mxu0 %vm397_vm2, %v959_v3 }
 0x3f1   : > { %v979_v5 = vpop.f32.mrf.mxu0 }
 0x3f2   : > { %v980_v6 = vadd.f32 %v979_v5, %v952_v4 }
 0x3f4   : > { %982 = vst [vmem:[%s220_s13] sm:$0xf] %v980_v6 }
 0x3f5   : > { %1218 = shalt.err (!%p1215_p3)
}
 0x3f6   : > { %1152 = dma.vmem_to_hbm [thread:$0]  (%p1320_p5), %s997_s12, 64, %s999_s14, %s984_s15  }
 0x3f7 PF: > { %p1158_p4 = scmp.ge.s32.totalorder %s1253_s21, 2  ;;  %s1010_s30 = sand.u32 1, %s1241_s18  }
 0x3f8   : > { %s1011_s6 = scalar_lea.sflag [#allocation3], %s1010_s30 }
 0x3f9   : > { %p1155_p7 = pnand %p1158_p4, %p1324_p6 }
 0x3fb   : > { %p1156_p8 = pneg %p1155_p7 }
 0x3fd   : > { %1236 = dma.done.wait (%p1156_p8), %s1011_s6, 64  }
 0x3fe   : > { %1238 = vsyncadd (%p1156_p8), %s1011_s6, 4294967232  ;;  %p15_p9 = scmp.ge.s32.totalorder %s1308_s24, 4   ;;  %s1597_s18 = smov %s1245_s19 }
 0x3ff   : > { %s1598_s19 = smov %s1249_s20  ;;  %s1599_s20 = smov %s1318_s27 }
 0x400   : > { %s1600_s21 = smov %s1308_s24  ;;  %17 = sbr.rel (!%p15_p9) target bundleno = 3 (0x3), region = 78 }
 0x405   :  { %1017 = vsyncpa [#allocation3], 1 }
 0x406   :  { %1019 = vsyncpa [#allocation3 + $0x1], 1 }

</bundles_post_ra>
